<compile_context>
chip_gen: v6e
topology: v6e:2x2x1
jax: 0.10.0
libtpu: 0.0.40
codegen_flags: <defaults>
</compile_context>

<pallas_src>
import functools

import jax
import jax.numpy as jnp
from jax.experimental import pallas as pl
from jax.experimental.pallas import tpu as pltpu

LANE = 128         # lane width: last dim of every block is a multiple of this
BATCH_ALIGN = 16   # batch-tile alignment (bf16 packs 2 rows/sublane -> use 16, not 8)


def _round_up(x, m):
    return ((x + m - 1) // m) * m


def _cdiv(a, b):
    return -(-a // b)


def _vmem_budget_bytes():
    """~75% of physical VMEM (96 MiB on v5e/v6e, 48 MiB on v7x), capped at 100 MiB."""
    try:
        cap = int(pltpu.get_tpu_info().vmem_capacity_bytes)
    except Exception:
        # Hardware query unavailable on this build -> assume the smallest part (v7x, 64 MiB/TC).
        cap = 64 * 1024 * 1024
    return min(int(cap * 0.75), 100 * 1024 * 1024)


def _choose_hidden_tile(in_pad, hid_pad, out_pad, tb, budget):
    """Largest 128-multiple hidden tile whose per-step VMEM footprint fits the budget."""

    def vmem_use(th):
        return (2 * tb * in_pad * 4        # x tile (f32), double-buffered
                + 2 * in_pad * th * 2      # w1 tile (bf16), double-buffered
                + 2 * th * out_pad * 2     # w2 tile (bf16), double-buffered
                + 2 * 8 * th * 4           # b1 tile (f32, sublane-padded)
                + 2 * 8 * out_pad * 4      # b2 tile
                + 2 * tb * out_pad * 4     # output tile (f32), double-buffered
                + tb * out_pad * 4         # f32 accumulator scratch
                + tb * th * 6)             # fc1 intermediate: f32 h + bf16 re-cast copy

    th = hid_pad
    while th > LANE and vmem_use(th) > budget:
        th = _round_up(_cdiv(th, 2), LANE)
    return th


# --------------------------------------------------------------------------- kernel


def mlp_kernel(x_ref, w1_ref, b1_ref, w2_ref, b2_ref, o_ref, acc_ref):
    """One (batch tile, hidden tile) step of fc1 -> ReLU -> partial fc2.

    Grid = (batch tiles, hidden tiles); the hidden axis is the fc2 reduction.
    x arrives as f32 and is cast to bf16 in-kernel (VPU pack hides under the MXU);
    both matmuls run bf16 on the MXU with f32 accumulation; bias add / ReLU /
    sigmoid stay in f32.
    """
    k = pl.program_id(1)

    @pl.when(k == 0)
    def _():
        acc_ref[...] = jnp.zeros_like(acc_ref)

    # fc1 for this hidden tile: bf16 MXU matmul, f32 accumulate; bias + ReLU on VPU.
    x_bf16 = x_ref[...].astype(jnp.bfloat16)
    h = jnp.dot(x_bf16, w1_ref[...], preferred_element_type=jnp.float32)
    h = jnp.maximum(h + b1_ref[...], 0.0)

    # Partial fc2: accumulate this hidden tile's contribution in f32.
    acc_ref[...] += jnp.dot(h.astype(jnp.bfloat16), w2_ref[...],
                            preferred_element_type=jnp.float32)

    @pl.when(k == pl.num_programs(1) - 1)
    def _():
        y = acc_ref[...] + b2_ref[...]
        # Exact sigmoid: exp issues on the EUP; lane-dense, unmasked output store.
        o_ref[...] = (1.0 / (1.0 + jnp.exp(-y))).astype(o_ref.dtype)


@functools.lru_cache(maxsize=None)
def _build_call(tb, n_tiles, n_k, in_pad, th, out_pad, out_dtype_name, vmem_limit):
    out_dtype = jnp.dtype(out_dtype_name)
    return pl.pallas_call(
        mlp_kernel,
        out_shape=jax.ShapeDtypeStruct((n_tiles * tb, out_pad), out_dtype),
        grid_spec=pltpu.PrefetchScalarGridSpec(
            num_scalar_prefetch=0,
            grid=(n_tiles, n_k),                                       # reduction axis last
            in_specs=[
                pl.BlockSpec((tb, in_pad), lambda i, k: (i, 0)),       # x batch tile (f32)
                pl.BlockSpec((in_pad, th), lambda i, k: (0, k)),       # w1 column tile (bf16)
                pl.BlockSpec((1, th), lambda i, k: (0, k)),            # b1 tile (f32)
                pl.BlockSpec((th, out_pad), lambda i, k: (k, 0)),      # w2 row tile (bf16)
                pl.BlockSpec((1, out_pad), lambda i, k: (0, 0)),       # b2 (f32)
            ],
            out_specs=pl.BlockSpec((tb, out_pad), lambda i, k: (i, 0)),
            scratch_shapes=[pltpu.VMEM((tb, out_pad), jnp.float32)],   # fc2 accumulator
        ),
        compiler_params=pltpu.CompilerParams(
            # Batch tiles are independent (megacore-shardable); hidden axis is a reduction.
            dimension_semantics=("parallel", "arbitrary"),
            vmem_limit_bytes=int(vmem_limit),
        ),
    )


# --------------------------------------------------------------------------- wrapper


def prepare_params(w1, b1, w2, b2, *, max_batch_tile=None):
    """One-time weight prep: lane-pad, cast weights to bf16, pick tiling. Reused per forward."""
    in_dim, hid_dim = w1.shape
    assert w2.shape[0] == hid_dim
    out_dim = w2.shape[1]

    b1 = jnp.reshape(b1, (1, hid_dim)).astype(jnp.float32)
    b2 = jnp.reshape(b2, (1, out_dim)).astype(jnp.float32)

    budget = _vmem_budget_bytes()
    if max_batch_tile is None:
        # Smaller default batch tile on small-VMEM parts (v7x), larger on v5e/v6e.
        max_batch_tile = 256 if budget <= 48 * 1024 * 1024 else 512
    max_batch_tile = _round_up(max_batch_tile, BATCH_ALIGN)

    in_pad = _round_up(in_dim, LANE)
    out_pad = _round_up(out_dim, LANE)
    hid_base = _round_up(hid_dim, LANE)

    th = _choose_hidden_tile(in_pad, hid_base, out_pad, max_batch_tile, budget)
    n_k = _cdiv(hid_base, th)
    hid_pad = n_k * th  # zero padding is exact (padded hidden lanes contribute 0 via ReLU)

    w1_p = jnp.pad(w1.astype(jnp.float32),
                   ((0, in_pad - in_dim), (0, hid_pad - hid_dim))).astype(jnp.bfloat16)
    w2_p = jnp.pad(w2.astype(jnp.float32),
                   ((0, hid_pad - hid_dim), (0, out_pad - out_dim))).astype(jnp.bfloat16)
    b1_p = jnp.pad(b1, ((0, 0), (0, hid_pad - hid_dim)))
    b2_p = jnp.pad(b2, ((0, 0), (0, out_pad - out_dim)))

    return {
        "w1": w1_p, "b1": b1_p, "w2": w2_p, "b2": b2_p,
        "in_dim": in_dim, "hid_dim": hid_dim, "out_dim": out_dim,
        "in_pad": in_pad, "hid_pad": hid_pad, "out_pad": out_pad,
        "th": th, "n_k": n_k,
        "max_batch_tile": max_batch_tile,
        "vmem_limit": budget,
    }


def mlp_forward(x, params):
    """x: (B, input_size) -> sigmoid(relu(x @ w1 + b1) @ w2 + b2), (B, output_size)."""
    B, in_dim = x.shape
    assert in_dim == params["in_dim"], (in_dim, params["in_dim"])

    in_pad = params["in_pad"]
    out_pad = params["out_pad"]
    th = params["th"]
    n_k = params["n_k"]
    max_tile = params["max_batch_tile"]

    # Divisor-aware batch tiling: padding waste < BATCH_ALIGN rows per tile.
    n_tiles = _cdiv(B, max_tile)
    if n_tiles == 1 and B >= 32:
        n_tiles = 2  # keep both TensorCores busy on v7x; negligible overhead elsewhere
    tb = _round_up(_cdiv(B, n_tiles), BATCH_ALIGN)
    b_pad = n_tiles * tb

    x_p = x.astype(jnp.float32)
    if (b_pad, in_pad) != (B, in_dim):
        x_p = jnp.pad(x_p, ((0, b_pad - B), (0, in_pad - in_dim)))

    call = _build_call(tb, n_tiles, n_k, in_pad, th, out_pad,
                       jnp.dtype(x.dtype).name, params["vmem_limit"])
    out = call(x_p, params["w1"], params["b1"], params["w2"], params["b2"])
    return out[:B, :params["out_dim"]]


def init_params(key, input_size, hidden_size, output_size):
    # Deterministic synthetic init, matching torch.nn.Linear's U(-1/sqrt(fan_in), ...).
    k1, k2, k3, k4 = jax.random.split(key, 4)
    lim1 = 1.0 / jnp.sqrt(jnp.float32(input_size))
    lim2 = 1.0 / jnp.sqrt(jnp.float32(hidden_size))
    w1 = jax.random.uniform(k1, (input_size, hidden_size), jnp.float32, -lim1, lim1)
    b1 = jax.random.uniform(k2, (1, hidden_size), jnp.float32, -lim1, lim1)
    w2 = jax.random.uniform(k3, (hidden_size, output_size), jnp.float32, -lim2, lim2)
    b2 = jax.random.uniform(k4, (1, output_size), jnp.float32, -lim2, lim2)
    return w1, b1, w2, b2


def _ref_bf16(x, w1, b1, w2, b2):
    # Same bf16-MXU / f32-accumulate recipe as the kernel, exact sigmoid.
    xb, w1b, w2b = x.astype(jnp.bfloat16), w1.astype(jnp.bfloat16), w2.astype(jnp.bfloat16)
    h = jnp.maximum(jnp.dot(xb, w1b, preferred_element_type=jnp.float32) + b1, 0.0)
    y = jnp.dot(h.astype(jnp.bfloat16), w2b, preferred_element_type=jnp.float32) + b2
    return jax.nn.sigmoid(y)


if __name__ == "__main__":
    # Small shapes consistent with the module: batch=8, input=32, hidden=32, output=16.
    input_size, hidden_size, output_size = 32, 32, 16
    batch = 8

    key = jax.random.PRNGKey(0)
    kx, kx2, kp = jax.random.split(key, 3)
    x = jax.random.normal(kx, (batch, input_size), dtype=jnp.float32)
    w1, b1, w2, b2 = init_params(kp, input_size, hidden_size, output_size)

    # One-time weight prep (padding + bf16 cast hoisted out of the forward path).
    params = prepare_params(w1, b1, w2, b2)

    out = mlp_forward(x, params)
    out = jax.block_until_ready(out)
    assert out.shape == (batch, output_size)

    ref = _ref_bf16(x, w1, b1, w2, b2)
    assert jnp.allclose(out, ref, atol=5e-3, rtol=5e-3), \
        float(jnp.max(jnp.abs(out - ref)))

    # Sanity vs the full-f32 PyTorch-equivalent math (looser: bf16 MXU inputs).
    ref_f32 = jax.nn.sigmoid(jnp.maximum(x @ w1 + b1, 0.0) @ w2 + b2)
    assert jnp.allclose(out, ref_f32, atol=3e-2, rtol=3e-2)

    # Second forward with a different batch (B >= 32 -> 2 batch tiles), reusing the
    # same prepared params; exercises the multi-tile grid path and the call cache.
    x2 = jax.random.normal(kx2, (40, input_size), dtype=jnp.float32)
    out2 = jax.block_until_ready(mlp_forward(x2, params))
    assert out2.shape == (40, output_size)
    ref2 = _ref_bf16(x2, w1, b1, w2, b2)
    assert jnp.allclose(out2, ref2, atol=5e-3, rtol=5e-3), \
        float(jnp.max(jnp.abs(out2 - ref2)))

    print("KERNEL_OK")
</pallas_src>

<mosaic_0001>
module attributes {stable_mosaic.version = 11 : i64} {
  func.func @mlp_kernel(%arg0: i32, %arg1: i32, %arg2: memref<16x128xf32, #tpu.memory_space<vmem>>, %arg3: memref<128x128xbf16, #tpu.memory_space<vmem>>, %arg4: memref<1x128xf32, #tpu.memory_space<vmem>>, %arg5: memref<128x128xbf16, #tpu.memory_space<vmem>>, %arg6: memref<1x128xf32, #tpu.memory_space<vmem>>, %arg7: memref<16x128xf32, #tpu.memory_space<vmem>>, %arg8: memref<16x128xf32, #tpu.memory_space<vmem>>) attributes {dimension_semantics = [#tpu.dimension_semantics<parallel>, #tpu.dimension_semantics<arbitrary>], iteration_bounds = array<i64: 1, 1>, scalar_prefetch = 0 : i64, scratch_operands = 1 : i64, tpu.core_type = #tpu.core_type<tc>, window_params = [{transform_indices = @transform_0, window_bounds = array<i64: 16, 128>}, {transform_indices = @transform_1, window_bounds = array<i64: 128, 128>}, {transform_indices = @transform_2, window_bounds = array<i64: 1, 128>}, {transform_indices = @transform_3, window_bounds = array<i64: 128, 128>}, {pipeline_mode = #tpu.pipeline_mode<synchronous>, transform_indices = @transform_4, window_bounds = array<i64: 1, 128>}, {transform_indices = @transform_5, window_bounds = array<i64: 16, 128>}]} {
    %c0_i32 = arith.constant 0 : i32
    %0 = arith.cmpi eq, %arg1, %c0_i32 : i32
    %1 = arith.extui %0 : i1 to i32
    %c0_i32_0 = arith.constant 0 : i32
    %2 = arith.cmpi ne, %1, %c0_i32_0 : i32
    scf.if %2 {
      %cst_16 = arith.constant 0.000000e+00 : f32
      %21 = vector.broadcast %cst_16 : f32 to vector<16x128xf32>
      %c0_17 = arith.constant 0 : index
      %c0_18 = arith.constant 0 : index
      %22 = vector.load %arg8[%c0_17, %c0_18] : memref<16x128xf32, #tpu.memory_space<vmem>>, vector<16x128xf32>
      tpu.vector_store %arg8[%c0_17, %c0_18], %21 {strides = array<i32>} : memref<16x128xf32, #tpu.memory_space<vmem>>, vector<16x128xf32>,
    } else {
    }
    %c0 = arith.constant 0 : index
    %c0_1 = arith.constant 0 : index
    %3 = vector.load %arg2[%c0, %c0_1] : memref<16x128xf32, #tpu.memory_space<vmem>>, vector<16x128xf32>
    %4 = arith.truncf %3 : vector<16x128xf32> to vector<16x128xbf16>
    %c0_2 = arith.constant 0 : index
    %c0_3 = arith.constant 0 : index
    %5 = vector.load %arg3[%c0_2, %c0_3] : memref<128x128xbf16, #tpu.memory_space<vmem>>, vector<128x128xbf16>
    %cst = arith.constant dense<0.000000e+00> : vector<16x128xf32>
    %6 = tpu.matmul %4, %5, %cst {dimension_numbers = #tpu.dot_dimension_numbers<[1], [0], [0], [1], [0, 0, 1, 1], [], []>} : vector<16x128xbf16>, vector<128x128xbf16>, vector<16x128xf32> -> vector<16x128xf32>
    %c0_4 = arith.constant 0 : index
    %c0_5 = arith.constant 0 : index
    %7 = vector.load %arg4[%c0_4, %c0_5] : memref<1x128xf32, #tpu.memory_space<vmem>>, vector<1x128xf32>
    %8 = vector.broadcast %7 : vector<1x128xf32> to vector<16x128xf32>
    %9 = arith.addf %6, %8 : vector<16x128xf32>
    %cst_6 = arith.constant 0.000000e+00 : f32
    %10 = vector.broadcast %cst_6 : f32 to vector<16x128xf32>
    %11 = arith.maximumf %9, %10 : vector<16x128xf32>
    %c0_7 = arith.constant 0 : index
    %c0_8 = arith.constant 0 : index
    %12 = vector.load %arg8[%c0_7, %c0_8] : memref<16x128xf32, #tpu.memory_space<vmem>>, vector<16x128xf32>
    %13 = arith.truncf %11 : vector<16x128xf32> to vector<16x128xbf16>
    %c0_9 = arith.constant 0 : index
    %c0_10 = arith.constant 0 : index
    %14 = vector.load %arg5[%c0_9, %c0_10] : memref<128x128xbf16, #tpu.memory_space<vmem>>, vector<128x128xbf16>
    %cst_11 = arith.constant dense<0.000000e+00> : vector<16x128xf32>
    %15 = tpu.matmul %13, %14, %cst_11 {dimension_numbers = #tpu.dot_dimension_numbers<[1], [0], [0], [1], [0, 0, 1, 1], [], []>} : vector<16x128xbf16>, vector<128x128xbf16>, vector<16x128xf32> -> vector<16x128xf32>
    %16 = arith.addf %12, %15 : vector<16x128xf32>
    %c0_12 = arith.constant 0 : index
    %c0_13 = arith.constant 0 : index
    %17 = vector.load %arg8[%c0_12, %c0_13] : memref<16x128xf32, #tpu.memory_space<vmem>>, vector<16x128xf32>
    tpu.vector_store %arg8[%c0_12, %c0_13], %16 {strides = array<i32>} : memref<16x128xf32, #tpu.memory_space<vmem>>, vector<16x128xf32>,
    %c0_i32_14 = arith.constant 0 : i32
    %18 = arith.cmpi eq, %arg1, %c0_i32_14 : i32
    %19 = arith.extui %18 : i1 to i32
    %c0_i32_15 = arith.constant 0 : i32
    %20 = arith.cmpi ne, %19, %c0_i32_15 : i32
    scf.if %20 {
      %c0_16 = arith.constant 0 : index
      %c0_17 = arith.constant 0 : index
      %21 = vector.load %arg8[%c0_16, %c0_17] : memref<16x128xf32, #tpu.memory_space<vmem>>, vector<16x128xf32>
      %c0_18 = arith.constant 0 : index
      %c0_19 = arith.constant 0 : index
      %22 = vector.load %arg6[%c0_18, %c0_19] : memref<1x128xf32, #tpu.memory_space<vmem>>, vector<1x128xf32>
      %23 = vector.broadcast %22 : vector<1x128xf32> to vector<16x128xf32>
      %24 = arith.addf %21, %23 : vector<16x128xf32>
      %cst_20 = arith.constant 0.000000e+00 : f32
      %25 = vector.broadcast %cst_20 : f32 to vector<16x128xf32>
      %26 = arith.subf %25, %24 : vector<16x128xf32>
      %27 = math.exp %26 : vector<16x128xf32>
      %cst_21 = arith.constant 1.000000e+00 : f32
      %28 = vector.broadcast %cst_21 : f32 to vector<16x128xf32>
      %29 = arith.addf %28, %27 : vector<16x128xf32>
      %cst_22 = arith.constant 1.000000e+00 : f32
      %30 = vector.broadcast %cst_22 : f32 to vector<16x128xf32>
      %31 = arith.divf %30, %29 : vector<16x128xf32>
      %c0_23 = arith.constant 0 : index
      %c0_24 = arith.constant 0 : index
      %32 = vector.load %arg7[%c0_23, %c0_24] : memref<16x128xf32, #tpu.memory_space<vmem>>, vector<16x128xf32>
      tpu.vector_store %arg7[%c0_23, %c0_24], %31 {strides = array<i32>} : memref<16x128xf32, #tpu.memory_space<vmem>>, vector<16x128xf32>,
    } else {
    }
    return
  }
  func.func @transform_0(%arg0: i32, %arg1: i32) -> (i32, i32) {
    %c0_i32 = arith.constant 0 : i32
    %c0_i32_0 = arith.constant 0 : i32
    return %arg0, %c0_i32 : i32, i32
  }
  func.func @transform_1(%arg0: i32, %arg1: i32) -> (i32, i32) {
    %c0_i32 = arith.constant 0 : i32
    %c0_i32_0 = arith.constant 0 : i32
    return %c0_i32, %arg1 : i32, i32
  }
  func.func @transform_2(%arg0: i32, %arg1: i32) -> (i32, i32) {
    %c0_i32 = arith.constant 0 : i32
    %c0_i32_0 = arith.constant 0 : i32
    return %c0_i32, %arg1 : i32, i32
  }
  func.func @transform_3(%arg0: i32, %arg1: i32) -> (i32, i32) {
    %c0_i32 = arith.constant 0 : i32
    %c0_i32_0 = arith.constant 0 : i32
    return %arg1, %c0_i32 : i32, i32
  }
  func.func @transform_4(%arg0: i32, %arg1: i32) -> (i32, i32) {
    %c0_i32 = arith.constant 0 : i32
    %c0_i32_0 = arith.constant 0 : i32
    %c0_i32_1 = arith.constant 0 : i32
    return %c0_i32, %c0_i32_0 : i32, i32
  }
  func.func @transform_5(%arg0: i32, %arg1: i32) -> (i32, i32) {
    %c0_i32 = arith.constant 0 : i32
    %c0_i32_0 = arith.constant 0 : i32
    return %arg0, %c0_i32 : i32, i32
  }
}

</mosaic_0001>

<bundles_post_ra>
// kernel: tpu_custom_call.1
= control target key start
LH: loop header
LB: loop body
LE: loop exit
PB: predicated region body
PF: predicated region fallthrough
CT: control target
= control target key end

     0   :  { %10 = vsyncpa [#allocation4], 0  ;;  %s604_s0 = inlined_call_operand.hbm [shape: f32[16,128], index: 0, kind: input, shape index: {}]   ;;  %s605_s1 = inlined_call_operand.hbm [shape: bf16[128,128], index: 1, kind: input, shape index: {}]   ;;  %s606_s2 = inlined_call_operand.vmem [shape: f32[1,128], index: 2, kind: input, shape index: {}]   ;;  %s607_s3 = inlined_call_operand.hbm [shape: bf16[128,128], index: 3, kind: input, shape index: {}]   ;;  %s608_s4 = inlined_call_operand.vmem [shape: f32[1,128], index: 4, kind: input, shape index: {}]   ;;  %s609_s5 = inlined_call_operand.hbm [shape: f32[16,128], index: 5, kind: output, shape index: {}]  }
   0x1   :  { %11 = vsyncpa [#allocation7], 0 }
   0x2   :  { %12 = vsyncpa [#allocation5], 0  ;;  %s540_s18 = smov [#allocation6]  }
   0x3   :  { %s30_s19 = sshll.u32 %s540_s18, 4  ;;  %s31_s19 = int_to_ptr.vmem [resolvable:$true] %s30_s19 }
   0x4   :  { %s462_s20 = scalar_lea.vmem %s31_s19, 1024  ;;  %p467_p1 = scmp.lt.s32.totalorder %s31_s19, %s31_s19 }
   0x5   :  { %p463_p0 = scmp.ne.s32.totalorder %s31_s19, %s462_s20  ;;  %p468_p2 = scmp.lt.s32.totalorder %s462_s20, %s462_s20 }
   0x7   :  { %p469_p3 = por %p468_p2, %p467_p1 }
   0x9   :  { %p470_p4 = pnand %p469_p3, %p463_p0 }
   0xb   :  { %473 = shalt.err (!%p470_p4)
}
   0xc   :  { %s541_s21 = smov 64   ;;  %s542_s22 = smov 4  }
   0xd   :  { %36 = dma.hbm_to_vmem [thread:$0]  %s605_s1, 1024, %s31_s19, [#allocation7], %s541_s21, %s541_s21, %s542_s22  }
   0xe   :  { %s543_s25 = smov [#allocation3]  }
   0xf   :  { %s18_s26 = sshll.u32 %s543_s25, 4  ;;  %s19_s26 = int_to_ptr.vmem [resolvable:$true] %s18_s26 }
  0x10   :  { %s482_s27 = scalar_lea.vmem %s19_s26, 256  ;;  %p487_p6 = scmp.lt.s32.totalorder %s19_s26, %s19_s26 }
  0x11   :  { %p483_p5 = scmp.ne.s32.totalorder %s19_s26, %s482_s27  ;;  %p488_p7 = scmp.lt.s32.totalorder %s482_s27, %s482_s27 }
  0x13   :  { %p489_p8 = por %p488_p7, %p487_p6 }
  0x15   :  { %p490_p9 = pnand %p489_p8, %p483_p5 }
  0x17   :  { %493 = shalt.err (!%p490_p9)
}
  0x18   :  { %s544_s28 = smov 128   ;;  %s545_s29 = smov 8  }
  0x19   :  { %24 = dma.hbm_to_vmem [thread:$0]  %s604_s0, 256, %s19_s26, [#allocation4], %s544_s28, %s544_s28, %s545_s29  }
  0x1a   :  { %s546_s1 = smov [#allocation8]  }
  0x1b   :  { %s44_s7 = sshll.u32 %s546_s1, 4  ;;  %s45_s7 = int_to_ptr.vmem [resolvable:$true] %s44_s7 }
  0x1c   :  { %s502_s8 = scalar_lea.vmem %s45_s7, 1024  ;;  %p507_p11 = scmp.lt.s32.totalorder %s45_s7, %s45_s7 }
  0x1d   :  { %p503_p10 = scmp.ne.s32.totalorder %s45_s7, %s502_s8  ;;  %p508_p12 = scmp.lt.s32.totalorder %s502_s8, %s502_s8 }
  0x1f   :  { %p509_p13 = por %p508_p12, %p507_p11 }
  0x21   :  { %p510_p0 = pnand %p509_p13, %p503_p10 }
  0x23   :  { %513 = shalt.err (!%p510_p0)
}
  0x24   :  { %50 = dma.hbm_to_vmem [thread:$0]  %s607_s3, 1024, %s45_s7, [#allocation7], %s541_s21, %s541_s21, %s542_s22  }
  0x25   :  { %534 = dma.done.wait [#allocation4], 256  }
  0x26   :  { %535 = vsyncadd [#allocation4], 4294967040 }
  0x27   :  { %536 = dma.done.wait [#allocation7], 2048  }
  0x28   :  { %537 = vsyncadd [#allocation7], 4294965248  ;;  %v547_v0 = vmov 0.0   ;;  %vm548_vm0 = vmmov 0   ;;  %v430_v1 = vld [vmem:[#allocation6 + $0x38] sm:$0xff]   ;;  %v431_v2 = vld [vmem:[#allocation6 + $0x30] sm:$0xff]  }
  0x29   :  { %380 = vmatprep.subr.bf16.mxu0 %v547_v0  ;;  %396 = vmatprep.mubr.msk.bf16.mxu0 %vm548_vm0, %v547_v0  ;;  %v432_v3 = vld [vmem:[#allocation6 + $0x28] sm:$0xff]   ;;  %v438_v4 = vld [vmem:[#allocation8 + $0x38] sm:$0xff]   ;;  %v433_v5 = vld [vmem:[#allocation6 + $0x20] sm:$0xff]  }
  0x2a   :  { %400 = vmatprep.subr.bf16.mxu1 %v547_v0  ;;  %416 = vmatprep.mubr.msk.bf16.mxu1 %vm548_vm0, %v547_v0  ;;  %v439_v6 = vld [vmem:[#allocation8 + $0x30] sm:$0xff]   ;;  %v434_v7 = vld [vmem:[#allocation6 + $0x18] sm:$0xff]   ;;  %v440_v8 = vld [vmem:[#allocation8 + $0x28] sm:$0xff]  }
  0x2b   :  { %381 = vmatpush3.bf16.msra.mxu0 %v430_v1  ;;  %401 = vmatpush3.bf16.msra.mxu1 %v438_v4  ;;  %v435_v9 = vld [vmem:[#allocation6 + $0x10] sm:$0xff]   ;;  %v441_v10 = vld [vmem:[#allocation8 + $0x20] sm:$0xff]   ;;  %v436_v11 = vld [vmem:[#allocation6 + $0x8] sm:$0xff]  }
  0x2c   :  { %382 = vmatprep.subr.bf16.mxu0 %v547_v0  ;;  %402 = vmatprep.subr.bf16.mxu1 %v547_v0  ;;  %v442_v12 = vld [vmem:[#allocation8 + $0x18] sm:$0xff]   ;;  %v437_v13 = vld [vmem:[#allocation6] sm:$0xff]   ;;  %v69_v14 = vld [vmem:[#allocation3] sm:$0xff] }
  0x2d   :  { %v70_v15 = vld [vmem:[#allocation3 + $0x8] sm:$0xff]  ;;  %v443_v17 = vld [vmem:[#allocation8 + $0x10] sm:$0xff]   ;;  %v444_v18 = vld [vmem:[#allocation8 + $0x8] sm:$0xff]  }
  0x2e   :  { %v71_v16 = vpack.c.bf16 %v70_v15, %v69_v14  ;;  %v445_v19 = vld [vmem:[#allocation8] sm:$0xff]   ;;  %v344_v20 = vld [vmem:[%s606_s2] ss:$0 sm:$0xff]  ;;  %s549_s2 = smov [#allocation9]  }
  0x2f   :  { %383 = vmatpush3.bf16.msra.mxu0 %v431_v2  ;;  %403 = vmatpush3.bf16.msra.mxu1 %v439_v6  ;;  %v361_v30 = vld [vmem:[%s608_s4] ss:$0 sm:$0xff]  ;;  %s331_s4 = sshll.u32 %s549_s2, 4  ;;  %s332_s4 = int_to_ptr.vmem [resolvable:$true] %s331_s4 }
  0x30   :  { %384 = vmatprep.subr.bf16.mxu0 %v547_v0  ;;  %404 = vmatprep.subr.bf16.mxu1 %v547_v0  ;;  %s514_s13 = scalar_lea.vmem %s332_s4, 256  ;;  %p519_p2 = scmp.lt.s32.totalorder %s332_s4, %s332_s4 }
  0x31   :  { %p515_p1 = scmp.ne.s32.totalorder %s332_s4, %s514_s13  ;;  %p520_p3 = scmp.lt.s32.totalorder %s514_s13, %s514_s13 }
  0x33   :  { %385 = vmatpush3.bf16.msra.mxu0 %v432_v3  ;;  %405 = vmatpush3.bf16.msra.mxu1 %v440_v8  ;;  %p521_p4 = por %p520_p3, %p519_p2 }
  0x34   :  { %386 = vmatprep.subr.bf16.mxu0 %v547_v0  ;;  %406 = vmatprep.subr.bf16.mxu1 %v547_v0 }
  0x35   :  { %p522_p5 = pnand %p521_p4, %p515_p1 }
  0x37   :  { %387 = vmatpush3.bf16.msra.mxu0 %v433_v5  ;;  %407 = vmatpush3.bf16.msra.mxu1 %v441_v10 }
  0x38   :  { %388 = vmatprep.subr.bf16.mxu0 %v547_v0  ;;  %408 = vmatprep.subr.bf16.mxu1 %v547_v0 }
  0x3b   :  { %389 = vmatpush3.bf16.msra.mxu0 %v434_v7  ;;  %409 = vmatpush3.bf16.msra.mxu1 %v442_v12 }
  0x3c   :  { %390 = vmatprep.subr.bf16.mxu0 %v547_v0  ;;  %410 = vmatprep.subr.bf16.mxu1 %v547_v0 }
  0x3f   :  { %391 = vmatpush3.bf16.msra.mxu0 %v435_v9  ;;  %411 = vmatpush3.bf16.msra.mxu1 %v443_v17 }
  0x40   :  { %392 = vmatprep.subr.bf16.mxu0 %v547_v0  ;;  %412 = vmatprep.subr.bf16.mxu1 %v547_v0 }
  0x43   :  { %393 = vmatpush3.bf16.msra.mxu0 %v436_v11  ;;  %413 = vmatpush3.bf16.msra.mxu1 %v444_v18 }
  0x44   :  { %394 = vmatprep.subr.bf16.mxu0 %v547_v0  ;;  %414 = vmatprep.subr.bf16.mxu1 %v547_v0 }
  0x47   :  { %395 = vmatpush3.bf16.msra.mxu0 %v437_v13  ;;  %415 = vmatpush3.bf16.msra.mxu1 %v445_v19 }
  0x4a   :  { %397 = vmatmul.mubr.bf16.vlgmr.msra.gmra.mxu0 %v71_v16 }
 0x10a   :  { %v177_v21 = vpop.f32.mrf.mxu0 }
 0x10b   :  { %v178_v23 = vadd.f32 %v344_v20, %v177_v21 }
 0x10c   :  { %v398_v22 = vpop.f32.mrf.mxu0 }
 0x10d   :  { %v184_v27 = vmax.f32 %v178_v23, 0.0 }
 0x10e   :  { %v180_v24 = vpop.f32.mrf.mxu0 }
 0x10f   :  { %v181_v25 = vadd.f32 %v344_v20, %v180_v24 }
 0x110   :  { %v399_v26 = vpop.f32.mrf.mxu0 }
 0x111   :  { %v185_v28 = vmax.f32 %v181_v25, 0.0 }
 0x113   :  { %v188_v29 = vpack.c.bf16 %v185_v28, %v184_v27 }
 0x115   :  { %417 = vmatmul.mubr.bf16.vlgmr.msra.gmra.mxu1 %v188_v29 }
 0x1d5   :  { %v287_v31 = vpop.f32.mrf.mxu1 }
 0x1d6   :  { %v310_v32 = vadd.f32 %v361_v30, %v287_v31 }
 0x1d7   :  { %v418_v33 = vpop.f32.mrf.mxu1 }
 0x1d8   :  { %v312_v34 = vsub.f32 0.0, %v310_v32 }
 0x1d9   :  { %v290_v35 = vpop.f32.mrf.mxu1 }
 0x1da   :  { %v314_v36 = vmul.f32 1.442695, %v312_v34  ;;  %v311_v37 = vadd.f32 %v361_v30, %v290_v35 }
 0x1db   :  { %v419_v38 = vpop.f32.mrf.mxu1 }
 0x1dc   :  { %446 = vpow2.f32 %v314_v36  ;;  %v313_v39 = vsub.f32 0.0, %v311_v37 }
 0x1de   :  { %v316_v40 = vmul.f32 1.442695, %v313_v39 }
 0x1e0   :  { %448 = vpow2.f32 %v316_v40 }
 0x1e9   :  { %v447_v41 = vpop.eup %446 }
 0x1ea   :  { %v318_v42 = vadd.f32 1.0, %v447_v41 }
 0x1ec   :  { %450 = vrcp.f32 %v318_v42 }
 0x1ed   :  { %v449_v43 = vpop.eup %448 }
 0x1ee   :  { %v319_v44 = vadd.f32 1.0, %v449_v43 }
 0x1f0   :  { %452 = vrcp.f32 %v319_v44 }
 0x1f9   :  { %v451_v45 = vpop.eup %450 }
 0x1fa   :  { %324 = vst [vmem:[#allocation9] sm:$0xff] %v451_v45 }
 0x1fd   :  { %v453_v46 = vpop.eup %452 }
 0x1fe   :  { %325 = vst [vmem:[#allocation9 + $0x8] sm:$0xff] %v453_v46 }
 0x1ff   :  { %525 = shalt.err (!%p522_p5)
}
 0x200   :  { %337 = dma.vmem_to_hbm [thread:$0]  %s332_s4, 256, %s609_s5, [#allocation5], %s544_s28, %s544_s28, %s545_s29  }
 0x201   :  { %538 = dma.done.wait [#allocation5], 256  }
 0x202   :  { %539 = vsyncadd [#allocation5], 4294967040 }
 0x203   :  { %341 = vsyncpa [#allocation4], 1 }
 0x204   :  { %342 = vsyncpa [#allocation7], 1 }
 0x205   :  { %343 = vsyncpa [#allocation5], 1 }

</bundles_post_ra>
